<compile_context>
chip_gen: v6e
topology: v6e:2x2x1
jax: 0.10.0
libtpu: 0.0.40
codegen_flags: <defaults>
</compile_context>

<pallas_src>
import jax
import jax.numpy as jnp
from jax.experimental import pallas as pl
from jax.experimental.pallas import tpu as pltpu


def _round_up(x: int, m: int) -> int:
    return ((x + m - 1) // m) * m


def _pick_out_tiling(out_dim: int, cap: int = 2048):
    """Choose (TN, Dout_padded): TN a multiple of 128, Dout_padded % TN == 0,
    with minimal padding waste for awkward out_dim."""
    d128 = _round_up(out_dim, 128)
    if d128 <= cap:
        # Single column tile; padding < 128 columns.
        return d128, d128
    # Look for a large divisor tile -> zero extra padding beyond 128-alignment.
    for tn in range(cap, 511, -128):
        if d128 % tn == 0:
            return tn, d128
    # Fallback: fixed cap-sized tile; padding < cap columns (small fraction for large out_dim).
    return cap, _round_up(out_dim, cap)


def _linear_kernel(x_ref, wt_ref, b_ref, o_ref):
    # x_ref : (TM, Din)   VMEM activation tile
    # wt_ref: (Din, TN)   VMEM pre-transposed weight tile (resident along inner grid axis)
    # b_ref : (1,  TN)    VMEM bias tile
    # o_ref : (TM, TN)    VMEM output tile (partial blocks masked by Pallas)
    acc = jnp.dot(x_ref[...], wt_ref[...], preferred_element_type=jnp.float32)
    o_ref[...] = (acc + b_ref[...]).astype(o_ref.dtype)


def pallas_linear_t(x, wt_padded, bias_padded_2d, out_dim, *, tn, tm_cap=256,
                    out_dtype=jnp.float32):
    """out = x @ wt_padded + bias, exact shape (B, out_dim).

    `wt_padded`     : (Din, Dout_p) pre-transposed, lane-padded weight (Dout_p % tn == 0)
    `bias_padded_2d`: (1, Dout_p) f32
    """
    B, Din = x.shape
    Din_w, Dout_p = wt_padded.shape
    assert Din == Din_w, (Din, Din_w)
    assert Dout_p % tn == 0, (Dout_p, tn)

    TM = min(tm_cap, _round_up(B, 8))
    TN = tn
    n_i = pl.cdiv(B, TM)      # batch tiles (inner axis)
    n_j = Dout_p // TN        # output-feature tiles (outer axis)
    # Outer = output-feature tiles, inner = batch tiles: weight block index is
    # constant along the inner axis, so the Din*Dout_p weight stream is DMA'd
    # from HBM exactly once.
    grid = (n_j, n_i)

    cost = pl.CostEstimate(
        flops=2 * (n_i * TM) * Din * Dout_p,
        transcendentals=0,
        bytes_accessed=(
            n_j * B * Din * x.dtype.itemsize                     # activation re-read per column tile
            + Din * Dout_p * wt_padded.dtype.itemsize            # weight streamed once
            + Dout_p * bias_padded_2d.dtype.itemsize
            + B * min(out_dim, Dout_p) * jnp.dtype(out_dtype).itemsize
        ),
    )

    return pl.pallas_call(
        _linear_kernel,
        out_shape=jax.ShapeDtypeStruct((B, out_dim), out_dtype),
        grid_spec=pl.GridSpec(
            grid=grid,
            in_specs=[
                pl.BlockSpec((TM, Din), lambda j, i: (i, 0)),
                pl.BlockSpec((Din, TN), lambda j, i: (0, j)),
                pl.BlockSpec((1, TN), lambda j, i: (0, j)),
            ],
            out_specs=pl.BlockSpec((TM, TN), lambda j, i: (i, j)),
        ),
        compiler_params=pltpu.CompilerParams(
            dimension_semantics=("parallel", "parallel"),
            vmem_limit_bytes=32 * 1024 * 1024,
        ),
        cost_estimate=cost,
    )(x, wt_padded, bias_padded_2d)


class LinearDecoderPallas:
    """JAX/Pallas port of scvi LinearDecoder."""

    def __init__(self, latent_dim, output_dim, n_cat_list=None, n_cont=0,
                 key=None, weight_dtype=jnp.bfloat16, tn_cap=2048):
        # Matches the PyTorch spec exactly: filter cardinalities > 1 in __init__
        # and zip the filtered list positionally against *cat_list in forward().
        self.n_cat_list = [n for n in (n_cat_list or []) if n > 1]
        self.n_cont = n_cont
        total_cov = sum(self.n_cat_list) + self.n_cont
        in_dim = latent_dim + total_cov
        self.output_dim = output_dim
        self.compute_dtype = weight_dtype

        if key is None:
            key = jax.random.PRNGKey(0)
        k_w, k_b = jax.random.split(key)
        # Same shapes as nn.Linear(in_dim, output_dim): weight (Dout, Din), bias (Dout,)
        bound = 1.0 / float(in_dim) ** 0.5
        self.weight = jax.random.uniform(
            k_w, (output_dim, in_dim), dtype=jnp.float32, minval=-bound, maxval=bound
        )
        self.bias = jax.random.uniform(
            k_b, (output_dim,), dtype=jnp.float32, minval=-bound, maxval=bound
        )

        # --- One-time weight preparation: transpose, cast, minimally pad Dout ---
        self.tn, dout_p = _pick_out_tiling(output_dim, cap=tn_cap)
        wt = self.weight.T.astype(weight_dtype)                  # (Din, Dout)
        self.wt_padded = jnp.pad(wt, ((0, 0), (0, dout_p - output_dim)))
        self.bias_padded = jnp.pad(self.bias, (0, dout_p - output_dim)).reshape(1, dout_p)

    def __call__(self, z, *cat_list, cont=None):
        # TODO(synk): fuse the one-hot/concat into the kernel as gathered weight
        # rows via PrefetchScalarGridSpec (out = z@Wz + cont@Wc + Wcat[cat] + b);
        # modest win, kept as plain-JAX glue here.
        covs = []
        if cont is not None:
            covs.append(cont.astype(jnp.float32))
        for n_cat, cat in zip(self.n_cat_list, cat_list):
            oh = jax.nn.one_hot(jnp.squeeze(cat, axis=-1), n_cat, dtype=jnp.float32)
            covs.append(oh)
        inp = jnp.concatenate([z, *covs], axis=1) if covs else z
        inp = inp.astype(self.compute_dtype)   # bf16 activations when weights are bf16
        return pallas_linear_t(inp, self.wt_padded, self.bias_padded,
                               self.output_dim, tn=self.tn)


if __name__ == "__main__":
    key = jax.random.PRNGKey(0)
    k_z, k_cont, k_c0, k_c1, k_params = jax.random.split(key, 5)

    # Small shapes consistent with the module's forward.
    batch = 8
    latent_dim = 32
    output_dim = 64
    n_cat_list = [3, 4]   # both > 1, so both kept
    n_cont = 5

    z = jax.random.normal(k_z, (batch, latent_dim), dtype=jnp.float32)
    cont = jax.random.normal(k_cont, (batch, n_cont), dtype=jnp.float32)
    cat0 = jax.random.randint(k_c0, (batch, 1), 0, n_cat_list[0], dtype=jnp.int32)
    cat1 = jax.random.randint(k_c1, (batch, 1), 0, n_cat_list[1], dtype=jnp.int32)

    # Pure-JAX reference input.
    covs_ref = [cont,
                jax.nn.one_hot(cat0[:, 0], n_cat_list[0], dtype=jnp.float32),
                jax.nn.one_hot(cat1[:, 0], n_cat_list[1], dtype=jnp.float32)]
    inp_ref = jnp.concatenate([z, *covs_ref], axis=1)

    # Exact-PyTorch-parity instance (f32 weights).
    dec = LinearDecoderPallas(latent_dim, output_dim, n_cat_list, n_cont,
                              key=k_params, weight_dtype=jnp.float32)
    out = jax.block_until_ready(dec(z, cat0, cat1, cont=cont))
    ref = inp_ref @ dec.weight.T + dec.bias
    assert out.shape == (batch, output_dim)
    assert jnp.allclose(out, ref, atol=1e-5, rtol=1e-5)

    # Default (bf16-weight) instance: same semantics, looser tolerance by design.
    dec_bf16 = LinearDecoderPallas(latent_dim, output_dim, n_cat_list, n_cont, key=k_params)
    out_bf16 = jax.block_until_ready(dec_bf16(z, cat0, cat1, cont=cont))
    assert out_bf16.shape == (batch, output_dim)
    assert jnp.allclose(out_bf16.astype(jnp.float32), ref, atol=5e-2, rtol=5e-2)

    print("KERNEL_OK")
</pallas_src>

<mosaic_0001>
module attributes {stable_mosaic.version = 11 : i64} {
  func.func @_linear_kernel(%arg0: i32, %arg1: i32, %arg2: memref<8x44xf32, #tpu.memory_space<vmem>>, %arg3: memref<44x128xf32, #tpu.memory_space<vmem>>, %arg4: memref<1x128xf32, #tpu.memory_space<vmem>>, %arg5: memref<8x128xf32, #tpu.memory_space<vmem>>) attributes {dimension_semantics = [#tpu.dimension_semantics<parallel>, #tpu.dimension_semantics<parallel>], iteration_bounds = array<i64: 1, 1>, scalar_prefetch = 0 : i64, scratch_operands = 0 : i64, tpu.core_type = #tpu.core_type<tc>, window_params = [{transform_indices = @transform_0, window_bounds = array<i64: 8, 44>}, {transform_indices = @transform_1, window_bounds = array<i64: 44, 128>}, {transform_indices = @transform_2, window_bounds = array<i64: 1, 128>}, {transform_indices = @transform_3, window_bounds = array<i64: 8, 128>}]} {
    %c0 = arith.constant 0 : index
    %c0_0 = arith.constant 0 : index
    %0 = vector.load %arg2[%c0, %c0_0] : memref<8x44xf32, #tpu.memory_space<vmem>>, vector<8x44xf32>
    %c0_1 = arith.constant 0 : index
    %c0_2 = arith.constant 0 : index
    %1 = vector.load %arg3[%c0_1, %c0_2] : memref<44x128xf32, #tpu.memory_space<vmem>>, vector<44x128xf32>
    %cst = arith.constant dense<0.000000e+00> : vector<8x128xf32>
    %2 = tpu.matmul %0, %1, %cst {dimension_numbers = #tpu.dot_dimension_numbers<[1], [0], [0], [1], [0, 0, 1, 1], [], []>} : vector<8x44xf32>, vector<44x128xf32>, vector<8x128xf32> -> vector<8x128xf32>
    %c0_3 = arith.constant 0 : index
    %c0_4 = arith.constant 0 : index
    %3 = vector.load %arg4[%c0_3, %c0_4] : memref<1x128xf32, #tpu.memory_space<vmem>>, vector<1x128xf32>
    %4 = vector.broadcast %3 : vector<1x128xf32> to vector<8x128xf32>
    %5 = arith.addf %2, %4 : vector<8x128xf32>
    %c0_5 = arith.constant 0 : index
    %c0_6 = arith.constant 0 : index
    %6 = vector.load %arg5[%c0_5, %c0_6] : memref<8x128xf32, #tpu.memory_space<vmem>>, vector<8x128xf32>
    tpu.vector_store %arg5[%c0_5, %c0_6], %5 {strides = array<i32>} : memref<8x128xf32, #tpu.memory_space<vmem>>, vector<8x128xf32>,
    return
  }
  func.func @transform_0(%arg0: i32, %arg1: i32) -> (i32, i32) {
    %c0_i32 = arith.constant 0 : i32
    %c0_i32_0 = arith.constant 0 : i32
    return %arg1, %c0_i32 : i32, i32
  }
  func.func @transform_1(%arg0: i32, %arg1: i32) -> (i32, i32) {
    %c0_i32 = arith.constant 0 : i32
    %c0_i32_0 = arith.constant 0 : i32
    return %c0_i32, %arg0 : i32, i32
  }
  func.func @transform_2(%arg0: i32, %arg1: i32) -> (i32, i32) {
    %c0_i32 = arith.constant 0 : i32
    %c0_i32_0 = arith.constant 0 : i32
    return %c0_i32, %arg0 : i32, i32
  }
  func.func @transform_3(%arg0: i32, %arg1: i32) -> (i32, i32) {
    %c0_i32 = arith.constant 0 : i32
    return %arg1, %arg0 : i32, i32
  }
}

</mosaic_0001>

<bundles_post_ra>
// kernel: tpu_custom_call.1
= control target key start
LH: loop header
LB: loop body
LE: loop exit
PB: predicated region body
PF: predicated region fallthrough
CT: control target
= control target key end

     0   :  { %8 = vsyncpa [#allocation3], 0  ;;  %s287_s0 = inlined_call_operand.hbm [shape: f32[8,44], index: 0, kind: input, shape index: {}]   ;;  %s288_s1 = inlined_call_operand.hbm [shape: f32[44,128], index: 1, kind: input, shape index: {}]   ;;  %s289_s2 = inlined_call_operand.vmem [shape: f32[1,128], index: 2, kind: input, shape index: {}]   ;;  %s290_s3 = inlined_call_operand.hbm [shape: f32[8,64], index: 3, kind: output, shape index: {}]  }
   0x1   :  { %9 = vsyncpa [#allocation6], 0 }
   0x2   :  { %10 = vsyncpa [#allocation4], 0  ;;  %s248_s12 = smov [#allocation2]   ;;  %s249_s14 = smov [#allocation5]  }
   0x3   :  { %s17_s13 = sshll.u32 %s248_s12, 4  ;;  %s26_s15 = sshll.u32 %s249_s14, 4  ;;  %s18_s13 = int_to_ptr.vmem [resolvable:$true] %s17_s13  ;;  %s27_s15 = int_to_ptr.vmem [resolvable:$true] %s26_s15 }
   0x4   :  { %s190_s16 = scalar_lea.vmem %s18_s13, 128  ;;  %p195_p1 = scmp.lt.s32.totalorder %s18_s13, %s18_s13 }
   0x5   :  { %p191_p0 = scmp.ne.s32.totalorder %s18_s13, %s190_s16  ;;  %p196_p2 = scmp.lt.s32.totalorder %s190_s16, %s190_s16 }
   0x7   :  { %p197_p3 = por %p196_p2, %p195_p1 }
   0x9   :  { %p198_p4 = pnand %p197_p3, %p191_p0 }
   0xb   :  { %201 = shalt.err (!%p198_p4)
}
   0xc   :  { %20 = dma.hbm_to_vmem [thread:$0]  %s287_s0, 128, %s18_s13, [#allocation3]  }
   0xd   :  { %s210_s19 = scalar_lea.vmem %s27_s15, 768  ;;  %p215_p6 = scmp.lt.s32.totalorder %s27_s15, %s27_s15 }
   0xe   :  { %p211_p5 = scmp.ne.s32.totalorder %s27_s15, %s210_s19  ;;  %p216_p7 = scmp.lt.s32.totalorder %s210_s19, %s210_s19 }
  0x10   :  { %p217_p8 = por %p216_p7, %p215_p6 }
  0x12   :  { %p218_p9 = pnand %p217_p8, %p211_p5 }
  0x14   :  { %221 = shalt.err (!%p218_p9)
}
  0x15   :  { %s250_s20 = smov 128   ;;  %s251_s21 = smov 8  }
  0x16   :  { %32 = dma.hbm_to_vmem [thread:$0]  %s288_s1, 768, %s27_s15, [#allocation6], %s250_s20, %s250_s20, %s251_s21  }
  0x17   :  { %242 = dma.done.wait [#allocation3], 128  }
  0x18   :  { %243 = vsyncadd [#allocation3], 4294967168 }
  0x19   :  { %244 = dma.done.wait [#allocation6], 768  }
  0x1a   :  { %245 = vsyncadd [#allocation6], 4294966528  ;;  %v252_v0 = vmov 0.0   ;;  %vm253_vm0 = vmmov 0   ;;  %vm59_vm1 = vcmask 1043456   ;;  %v46_v2 = vld [vmem:[#allocation5 + $0x20] sm:$0xff] }
  0x1b   :  { %160 = vmatprep.subr.mxu0 %v252_v0  ;;  %172 = vmatprep.mubr.msk.f32.mxu0 %vm253_vm0, %v252_v0  ;;  %v47_v1 = vld [vmem:[#allocation5 + $0x28] sm:$0xf]  ;;  %v45_v3 = vld [vmem:[#allocation5 + $0x18] sm:$0xff]  ;;  %v44_v4 = vld [vmem:[#allocation5 + $0x10] sm:$0xff]  ;;  %vm55_vm2 = vcmask 359424   ;;  %s254_s24 = smov [#allocation7]  }
  0x1c   :  { %161 = vmatpush3.msk.msra.mxu0 %vm59_vm1, %v47_v1  ;;  %v43_v5 = vld [vmem:[#allocation5 + $0x8] sm:$0xff]  ;;  %v42_v6 = vld [vmem:[#allocation5] sm:$0xff]  ;;  %v41_v7 = vld [vmem:[#allocation2] sm:$0xff]  ;;  %s140_s25 = sshll.u32 %s254_s24, 4  ;;  %s141_s25 = int_to_ptr.vmem [resolvable:$true] %s140_s25 }
  0x1d   :  { %162 = vmatprep.subr.mxu0 %v252_v0  ;;  %v150_v8 = vld [vmem:[%s289_s2] ss:$0 sm:$0xff]  ;;  %s222_s26 = scalar_lea.vmem %s141_s25, 128  ;;  %p227_p11 = scmp.lt.s32.totalorder %s141_s25, %s141_s25 }
  0x1e   :  { %163 = vmatpush3.msra.mxu0 %v46_v2  ;;  %p223_p10 = scmp.ne.s32.totalorder %s141_s25, %s222_s26  ;;  %p228_p12 = scmp.lt.s32.totalorder %s222_s26, %s222_s26 }
  0x1f   :  { %164 = vmatprep.subr.mxu0 %v252_v0 }
  0x20   :  { %165 = vmatpush3.msra.mxu0 %v45_v3  ;;  %p229_p13 = por %p228_p12, %p227_p11 }
  0x21   :  { %166 = vmatprep.subr.mxu0 %v252_v0 }
  0x22   :  { %167 = vmatpush3.msra.mxu0 %v44_v4  ;;  %p230_p0 = pnand %p229_p13, %p223_p10 }
  0x23   :  { %168 = vmatprep.subr.mxu0 %v252_v0 }
  0x24   :  { %169 = vmatpush3.msra.mxu0 %v43_v5 }
  0x25   :  { %170 = vmatprep.subr.mxu0 %v252_v0 }
  0x26   :  { %171 = vmatpush3.msra.mxu0 %v42_v6 }
  0x27   :  { %173 = vmatmul.mubr.msk.f32.vlgmr.msra.gmra.mxu0 %vm55_vm2, %v41_v7 }
  0xe7   :  { %v129_v9 = vpop.f32.mrf.mxu0 }
  0xe8   :  { %v130_v10 = vadd.f32 %v150_v8, %v129_v9 }
  0xe9   :  { %v174_v11 = vpop.f32.mrf.mxu0 }
  0xea   :  { %133 = vst [vmem:[#allocation7] sm:$0xff] %v130_v10 }
  0xeb   :  { %233 = shalt.err (!%p230_p0)
}
  0xec   :  { %143 = dma.vmem_to_hbm [thread:$0]  %s141_s25, 128, %s290_s3, [#allocation4]  }
  0xed   :  { %246 = dma.done.wait [#allocation4], 128  }
  0xee   :  { %247 = vsyncadd [#allocation4], 4294967168 }
  0xef   :  { %147 = vsyncpa [#allocation3], 1 }
  0xf0   :  { %148 = vsyncpa [#allocation6], 1 }
  0xf1   :  { %149 = vsyncpa [#allocation4], 1 }

</bundles_post_ra>
